<compile_context>
chip_gen: v6e
topology: v6e:2x2x1
jax: 0.10.0
libtpu: 0.0.40
codegen_flags: <defaults>
</compile_context>

<pallas_src>
import functools

import jax
import jax.numpy as jnp
from jax.experimental import pallas as pl
from jax.experimental.pallas import tpu as pltpu

_GRAY_R, _GRAY_G, _GRAY_B = 0.2989, 0.587, 0.114


def _round_up(x, m):
    return ((x + m - 1) // m) * m


def _rgb_to_grayscale(r, g, b):
    # torchvision rgb_to_grayscale weights
    return _GRAY_R * r + _GRAY_G * g + _GRAY_B * b


# ----------------------------- in-kernel ops --------------------------------


def _adjust_brightness(r, g, b, bf):
    # _blend(img, zeros, bf) -> clamp(img * bf, 0, 1)
    return (jnp.clip(r * bf, 0.0, 1.0),
            jnp.clip(g * bf, 0.0, 1.0),
            jnp.clip(b * bf, 0.0, 1.0))


def _adjust_saturation(r, g, b, sf):
    gray = _rgb_to_grayscale(r, g, b)
    blend = (1.0 - sf) * gray
    return (jnp.clip(sf * r + blend, 0.0, 1.0),
            jnp.clip(sf * g + blend, 0.0, 1.0),
            jnp.clip(sf * b + blend, 0.0, 1.0))


def _adjust_contrast(r, g, b, cf, mean):
    # mean = grayscale mean over the whole image (precomputed in wrapper)
    blend = (1.0 - cf) * mean
    return (jnp.clip(cf * r + blend, 0.0, 1.0),
            jnp.clip(cf * g + blend, 0.0, 1.0),
            jnp.clip(cf * b + blend, 0.0, 1.0))


def _adjust_hue(r, g, b, hf):
    # --- RGB -> HSV (torchvision _rgb2hsv semantics) ---
    maxc = jnp.maximum(jnp.maximum(r, g), b)
    minc = jnp.minimum(jnp.minimum(r, g), b)
    eqc = maxc == minc
    cr = maxc - minc
    ones = jnp.ones_like(maxc)
    # divides -> EUP approx reciprocals + multiplies
    inv_max = pl.reciprocal(jnp.where(eqc, ones, maxc), approx=True)
    inv_cr = pl.reciprocal(jnp.where(eqc, ones, cr), approx=True)
    s = cr * inv_max
    rc = (maxc - r) * inv_cr
    gc = (maxc - g) * inv_cr
    bc = (maxc - b) * inv_cr
    hr = jnp.where(maxc == r, bc - gc, 0.0)
    hg = jnp.where((maxc == g) & (maxc != r), 2.0 + rc - bc, 0.0)
    hb = jnp.where((maxc != g) & (maxc != r), 4.0 + gc - rc, 0.0)
    # fused: mod(mod(h/6 + 1, 1) + hf, 1) == mod(h/6 + 1 + hf, 1)
    h = jnp.mod((hr + hg + hb) * (1.0 / 6.0) + 1.0 + hf, 1.0)
    # --- HSV -> RGB (torchvision _hsv2rgb semantics; p/q/t clamps redundant
    #     for inputs in [0, 1] and dropped) ---
    v = maxc
    h6 = h * 6.0
    i_f = jnp.minimum(jnp.floor(h6), 5.0)   # sector id in {0..5}, stays in f32
    f = h6 - i_f
    p = v * (1.0 - s)
    q = v * (1.0 - s * f)
    t = v * (1.0 - s * (1.0 - f))

    def sel(a0, a1, a2, a3, a4, a5):
        out = jnp.where(i_f == 0.0, a0, a5)
        out = jnp.where(i_f == 1.0, a1, out)
        out = jnp.where(i_f == 2.0, a2, out)
        out = jnp.where(i_f == 3.0, a3, out)
        out = jnp.where(i_f == 4.0, a4, out)
        return out

    return (sel(v, q, p, p, t, v),
            sel(t, v, v, q, p, p),
            sel(p, p, t, t, v, v))


def _jitter_kernel(factors_ref, means_ref, x_ref, o_ref, *, ops):
    """One (1, 3, TR, LW) block of one image; `ops` = static tuple of op names."""
    img = pl.program_id(0)
    r = x_ref[0, 0].astype(jnp.float32)
    g = x_ref[0, 1].astype(jnp.float32)
    b = x_ref[0, 2].astype(jnp.float32)

    for op in ops:  # static (traced once) — applied in the permuted order
        if op == "brightness":
            r, g, b = _adjust_brightness(r, g, b, factors_ref[0])
        elif op == "contrast":
            r, g, b = _adjust_contrast(r, g, b, factors_ref[1], means_ref[img])
        elif op == "saturation":
            r, g, b = _adjust_saturation(r, g, b, factors_ref[2])
        elif op == "hue":
            r, g, b = _adjust_hue(r, g, b, factors_ref[3])

    o_ref[0, 0] = r.astype(o_ref.dtype)
    o_ref[0, 1] = g.astype(o_ref.dtype)
    o_ref[0, 2] = b.astype(o_ref.dtype)


# ----------------------------- pallas wrapper --------------------------------


def _run_jitter_pass(x, factors, means, ops, tr, lw):
    n, c, rows_pad, lw_ = x.shape
    assert c == 3 and lw_ == lw and rows_pad % tr == 0
    kernel = functools.partial(_jitter_kernel, ops=tuple(ops))
    smem = pltpu.MemorySpace.SMEM

    def img_spec():
        return pl.BlockSpec((1, 3, tr, lw), lambda i, j: (i, 0, j, 0))

    return pl.pallas_call(
        kernel,
        out_shape=jax.ShapeDtypeStruct(x.shape, x.dtype),
        grid_spec=pltpu.PrefetchScalarGridSpec(
            num_scalar_prefetch=0,
            grid=(n, rows_pad // tr),
            in_specs=[
                pl.BlockSpec(memory_space=smem),   # factors (4,) f32
                pl.BlockSpec(memory_space=smem),   # per-image gray means (N,)
                img_spec(),
            ],
            out_specs=img_spec(),
        ),
        compiler_params=pltpu.CompilerParams(
            dimension_semantics=("parallel", "parallel"),
            vmem_limit_bytes=32 * 1024 * 1024,
        ),
    )(factors, means, x)


def group_color_jitter(imgs, *, fn_idx, brightness_factor, contrast_factor,
                       saturation_factor, hue_factor):
    """imgs: (N, 3, H, W) float32 in [0, 1]. Returns jittered (N, 3, H, W)."""
    n, c, h, w = imgs.shape
    assert c == 3, "GroupColorJitter kernel expects 3-channel RGB images"

    factor_of = {0: brightness_factor, 1: contrast_factor,
                 2: saturation_factor, 3: hue_factor}
    name_of = {0: "brightness", 1: "contrast", 2: "saturation", 3: "hue"}
    active_ops = [name_of[int(i)] for i in fn_idx
                  if factor_of[int(i)] is not None]
    if not active_ops:
        return imgs

    # Runtime scalars (inactive slots hold placeholders that are never read).
    factors = jnp.array(
        [brightness_factor if brightness_factor is not None else 1.0,
         contrast_factor if contrast_factor is not None else 1.0,
         saturation_factor if saturation_factor is not None else 1.0,
         hue_factor if hue_factor is not None else 0.0], dtype=jnp.float32)

    # --- lane-dense padded layout: (N, 3, H, W) -> (N, 3, rows_pad, LW) ---
    p = h * w
    lw = 512 if p >= 4096 else 128                    # lanes, multiple of 128
    rows = (p + lw - 1) // lw
    tr = min(max(8, _round_up(65536 // lw, 8)),       # ~0.75 MB f32 blocks
             _round_up(rows, 8))
    rows_pad = _round_up(rows, tr)
    p_pad = rows_pad * lw

    x = jnp.pad(imgs.astype(jnp.float32).reshape(n, 3, p),
                ((0, 0), (0, 0), (0, p_pad - p)))
    x = x.reshape(n, 3, rows_pad, lw)

    # Split the permuted op order at contrast: its grayscale mean must be taken
    # over the whole image as it is *right before* contrast is applied.
    if "contrast" in active_ops:
        ci = active_ops.index("contrast")
        pre_ops, post_ops = tuple(active_ops[:ci]), tuple(active_ops[ci:])
    else:
        pre_ops, post_ops = (), tuple(active_ops)

    zero_means = jnp.zeros((n,), jnp.float32)
    if pre_ops:
        x = _run_jitter_pass(x, factors, zero_means, pre_ops, tr, lw)

    if "contrast" in post_ops:
        real = x.reshape(n, 3, p_pad)[:, :, :p]        # drop padded pixels
        gray = _rgb_to_grayscale(real[:, 0], real[:, 1], real[:, 2])
        means = jnp.mean(gray, axis=-1).astype(jnp.float32)
    else:
        means = zero_means

    y = _run_jitter_pass(x, factors, means, post_ops, tr, lw)
    out = y.reshape(n, 3, p_pad)[:, :, :p].reshape(n, 3, h, w)
    return out.astype(imgs.dtype)


# ----------------------------- pure-JAX reference ----------------------------


def _ref_color_jitter(imgs, fn_idx, bf, cf, sf, hf):
    def blend(i1, i2, ratio):
        return jnp.clip(ratio * i1 + (1.0 - ratio) * i2, 0.0, 1.0)

    def gray(img):
        return _rgb_to_grayscale(img[0], img[1], img[2])[None]

    def adj_brightness(img, f): return blend(img, jnp.zeros_like(img), f)
    def adj_contrast(img, f): return blend(img, jnp.mean(gray(img)), f)
    def adj_saturation(img, f): return blend(img, gray(img), f)

    def adj_hue(img, f):
        r, g, b = img[0], img[1], img[2]
        maxc = jnp.maximum(jnp.maximum(r, g), b)
        minc = jnp.minimum(jnp.minimum(r, g), b)
        eqc = maxc == minc
        cr = maxc - minc
        ones = jnp.ones_like(maxc)
        s = cr / jnp.where(eqc, ones, maxc)
        crd = jnp.where(eqc, ones, cr)
        rc = (maxc - r) / crd
        gc = (maxc - g) / crd
        bc = (maxc - b) / crd
        hr = jnp.where(maxc == r, bc - gc, 0.0)
        hg = jnp.where((maxc == g) & (maxc != r), 2.0 + rc - bc, 0.0)
        hb = jnp.where((maxc != g) & (maxc != r), 4.0 + gc - rc, 0.0)
        hch = jnp.mod(jnp.mod((hr + hg + hb) / 6.0 + 1.0, 1.0) + f, 1.0)
        v = maxc
        i = jnp.floor(hch * 6.0)
        fr = hch * 6.0 - i
        i = i.astype(jnp.int32) % 6
        pch = jnp.clip(v * (1.0 - s), 0.0, 1.0)
        qch = jnp.clip(v * (1.0 - s * fr), 0.0, 1.0)
        tch = jnp.clip(v * (1.0 - s * (1.0 - fr)), 0.0, 1.0)

        def sel(a0, a1, a2, a3, a4, a5):
            out = jnp.where(i == 0, a0, a5)
            out = jnp.where(i == 1, a1, out)
            out = jnp.where(i == 2, a2, out)
            out = jnp.where(i == 3, a3, out)
            out = jnp.where(i == 4, a4, out)
            return out

        return jnp.stack([sel(v, qch, pch, pch, tch, v),
                          sel(tch, v, v, qch, pch, pch),
                          sel(pch, pch, tch, tch, v, v)])

    outs = []
    for k in range(imgs.shape[0]):
        img = imgs[k]
        for fid in fn_idx:
            if fid == 0 and bf is not None:
                img = adj_brightness(img, bf)
            elif fid == 1 and cf is not None:
                img = adj_contrast(img, cf)
            elif fid == 2 and sf is not None:
                img = adj_saturation(img, sf)
            elif fid == 3 and hf is not None:
                img = adj_hue(img, hf)
        outs.append(img)
    return jnp.stack(outs)


if __name__ == "__main__":
    key = jax.random.PRNGKey(0)
    k_perm, k_b, k_c, k_s, k_h, k_img = jax.random.split(key, 6)

    # Module constructed as GroupColorJitter(0.4, 0.4, 0.4, 0.1):
    #   brightness/contrast/saturation ranges -> (0.6, 1.4), hue -> (-0.1, 0.1)
    # get_params(): random order + uniform draws (deterministic here).
    fn_idx = tuple(int(v) for v in jax.random.permutation(k_perm, 4))
    brightness_factor = float(jax.random.uniform(k_b, (), minval=0.6, maxval=1.4))
    contrast_factor = float(jax.random.uniform(k_c, (), minval=0.6, maxval=1.4))
    saturation_factor = float(jax.random.uniform(k_s, (), minval=0.6, maxval=1.4))
    hue_factor = float(jax.random.uniform(k_h, (), minval=-0.1, maxval=0.1))

    # img_group: N=2 RGB images of 16x16 in [0, 1]
    imgs = jax.random.uniform(k_img, (2, 3, 16, 16), dtype=jnp.float32)

    out = group_color_jitter(
        imgs,
        fn_idx=fn_idx,
        brightness_factor=brightness_factor,
        contrast_factor=contrast_factor,
        saturation_factor=saturation_factor,
        hue_factor=hue_factor)
    out = jax.block_until_ready(out)

    assert out.shape == imgs.shape and out.dtype == imgs.dtype
    assert bool(jnp.all(jnp.isfinite(out)))

    ref = _ref_color_jitter(imgs, fn_idx, brightness_factor, contrast_factor,
                            saturation_factor, hue_factor)
    max_err = float(jnp.max(jnp.abs(out - ref)))
    assert max_err < 2e-2, f"max abs error vs reference: {max_err}"

    print("KERNEL_OK")
</pallas_src>

<mosaic_0001>
module attributes {stable_mosaic.version = 11 : i64} {
  func.func @_jitter_kernel(%arg0: i32, %arg1: i32, %arg2: memref<4xf32, #tpu.memory_space<smem>>, %arg3: memref<2xf32, #tpu.memory_space<smem>>, %arg4: memref<1x3x8x128xf32, #tpu.memory_space<vmem>>, %arg5: memref<1x3x8x128xf32, #tpu.memory_space<vmem>>) attributes {dimension_semantics = [#tpu.dimension_semantics<parallel>, #tpu.dimension_semantics<parallel>], iteration_bounds = array<i64: 2, 1>, scalar_prefetch = 0 : i64, scratch_operands = 0 : i64, tpu.core_type = #tpu.core_type<tc>, window_params = [{transform_indices = @transform_0, window_bounds = array<i64: 4>}, {transform_indices = @transform_1, window_bounds = array<i64: 2>}, {transform_indices = @transform_2, window_bounds = array<i64: 1, 3, 8, 128>}, {transform_indices = @transform_3, window_bounds = array<i64: 1, 3, 8, 128>}]} {
    %c0 = arith.constant 0 : index
    %c0_0 = arith.constant 0 : index
    %c0_1 = arith.constant 0 : index
    %c0_2 = arith.constant 0 : index
    %0 = vector.load %arg4[%c0, %c0_0, %c0_1, %c0_2] : memref<1x3x8x128xf32, #tpu.memory_space<vmem>>, vector<1x1x8x128xf32>
    %1 = vector.shape_cast %0 : vector<1x1x8x128xf32> to vector<8x128xf32>
    %c0_3 = arith.constant 0 : index
    %c1 = arith.constant 1 : index
    %c0_4 = arith.constant 0 : index
    %c0_5 = arith.constant 0 : index
    %2 = vector.load %arg4[%c0_3, %c1, %c0_4, %c0_5] : memref<1x3x8x128xf32, #tpu.memory_space<vmem>>, vector<1x1x8x128xf32>
    %3 = vector.shape_cast %2 : vector<1x1x8x128xf32> to vector<8x128xf32>
    %c0_6 = arith.constant 0 : index
    %c2 = arith.constant 2 : index
    %c0_7 = arith.constant 0 : index
    %c0_8 = arith.constant 0 : index
    %4 = vector.load %arg4[%c0_6, %c2, %c0_7, %c0_8] : memref<1x3x8x128xf32, #tpu.memory_space<vmem>>, vector<1x1x8x128xf32>
    %5 = vector.shape_cast %4 : vector<1x1x8x128xf32> to vector<8x128xf32>
    %c0_9 = arith.constant 0 : index
    %6 = memref.load %arg2[%c0_9] : memref<4xf32, #tpu.memory_space<smem>>
    %7 = vector.broadcast %6 : f32 to vector<8x128xf32>
    %8 = arith.mulf %1, %7 : vector<8x128xf32>
    %cst = arith.constant 0.000000e+00 : f32
    %cst_10 = arith.constant 1.000000e+00 : f32
    %9 = vector.broadcast %cst : f32 to vector<8x128xf32>
    %10 = arith.maximumf %9, %8 : vector<8x128xf32>
    %11 = vector.broadcast %cst_10 : f32 to vector<8x128xf32>
    %12 = arith.minimumf %11, %10 : vector<8x128xf32>
    %13 = vector.broadcast %6 : f32 to vector<8x128xf32>
    %14 = arith.mulf %3, %13 : vector<8x128xf32>
    %cst_11 = arith.constant 0.000000e+00 : f32
    %cst_12 = arith.constant 1.000000e+00 : f32
    %15 = vector.broadcast %cst_11 : f32 to vector<8x128xf32>
    %16 = arith.maximumf %15, %14 : vector<8x128xf32>
    %17 = vector.broadcast %cst_12 : f32 to vector<8x128xf32>
    %18 = arith.minimumf %17, %16 : vector<8x128xf32>
    %19 = vector.broadcast %6 : f32 to vector<8x128xf32>
    %20 = arith.mulf %5, %19 : vector<8x128xf32>
    %cst_13 = arith.constant 0.000000e+00 : f32
    %cst_14 = arith.constant 1.000000e+00 : f32
    %21 = vector.broadcast %cst_13 : f32 to vector<8x128xf32>
    %22 = arith.maximumf %21, %20 : vector<8x128xf32>
    %23 = vector.broadcast %cst_14 : f32 to vector<8x128xf32>
    %24 = arith.minimumf %23, %22 : vector<8x128xf32>
    %c2_15 = arith.constant 2 : index
    %25 = memref.load %arg2[%c2_15] : memref<4xf32, #tpu.memory_space<smem>>
    %cst_16 = arith.constant 2.989000e-01 : f32
    %26 = vector.broadcast %cst_16 : f32 to vector<8x128xf32>
    %27 = arith.mulf %26, %12 : vector<8x128xf32>
    %cst_17 = arith.constant 5.870000e-01 : f32
    %28 = vector.broadcast %cst_17 : f32 to vector<8x128xf32>
    %29 = arith.mulf %28, %18 : vector<8x128xf32>
    %30 = arith.addf %27, %29 : vector<8x128xf32>
    %cst_18 = arith.constant 1.140000e-01 : f32
    %31 = vector.broadcast %cst_18 : f32 to vector<8x128xf32>
    %32 = arith.mulf %31, %24 : vector<8x128xf32>
    %33 = arith.addf %30, %32 : vector<8x128xf32>
    %cst_19 = arith.constant 1.000000e+00 : f32
    %34 = arith.subf %cst_19, %25 : f32
    %35 = vector.broadcast %34 : f32 to vector<8x128xf32>
    %36 = arith.mulf %35, %33 : vector<8x128xf32>
    %37 = vector.broadcast %25 : f32 to vector<8x128xf32>
    %38 = arith.mulf %37, %12 : vector<8x128xf32>
    %39 = arith.addf %38, %36 : vector<8x128xf32>
    %cst_20 = arith.constant 0.000000e+00 : f32
    %cst_21 = arith.constant 1.000000e+00 : f32
    %40 = vector.broadcast %cst_20 : f32 to vector<8x128xf32>
    %41 = arith.maximumf %40, %39 : vector<8x128xf32>
    %42 = vector.broadcast %cst_21 : f32 to vector<8x128xf32>
    %43 = arith.minimumf %42, %41 : vector<8x128xf32>
    %44 = vector.broadcast %25 : f32 to vector<8x128xf32>
    %45 = arith.mulf %44, %18 : vector<8x128xf32>
    %46 = arith.addf %45, %36 : vector<8x128xf32>
    %cst_22 = arith.constant 0.000000e+00 : f32
    %cst_23 = arith.constant 1.000000e+00 : f32
    %47 = vector.broadcast %cst_22 : f32 to vector<8x128xf32>
    %48 = arith.maximumf %47, %46 : vector<8x128xf32>
    %49 = vector.broadcast %cst_23 : f32 to vector<8x128xf32>
    %50 = arith.minimumf %49, %48 : vector<8x128xf32>
    %51 = vector.broadcast %25 : f32 to vector<8x128xf32>
    %52 = arith.mulf %51, %24 : vector<8x128xf32>
    %53 = arith.addf %52, %36 : vector<8x128xf32>
    %cst_24 = arith.constant 0.000000e+00 : f32
    %cst_25 = arith.constant 1.000000e+00 : f32
    %54 = vector.broadcast %cst_24 : f32 to vector<8x128xf32>
    %55 = arith.maximumf %54, %53 : vector<8x128xf32>
    %56 = vector.broadcast %cst_25 : f32 to vector<8x128xf32>
    %57 = arith.minimumf %56, %55 : vector<8x128xf32>
    %c0_26 = arith.constant 0 : index
    %c0_27 = arith.constant 0 : index
    %c0_28 = arith.constant 0 : index
    %c0_29 = arith.constant 0 : index
    %58 = vector.load %arg5[%c0_26, %c0_27, %c0_28, %c0_29] : memref<1x3x8x128xf32, #tpu.memory_space<vmem>>, vector<1x1x8x128xf32>
    %59 = vector.shape_cast %58 : vector<1x1x8x128xf32> to vector<8x128xf32>
    %60 = vector.shape_cast %43 : vector<8x128xf32> to vector<1x1x8x128xf32>
    tpu.vector_store %arg5[%c0_26, %c0_27, %c0_28, %c0_29], %60 {strides = array<i32>} : memref<1x3x8x128xf32, #tpu.memory_space<vmem>>, vector<1x1x8x128xf32>,
    %c0_30 = arith.constant 0 : index
    %c1_31 = arith.constant 1 : index
    %c0_32 = arith.constant 0 : index
    %c0_33 = arith.constant 0 : index
    %61 = vector.load %arg5[%c0_30, %c1_31, %c0_32, %c0_33] : memref<1x3x8x128xf32, #tpu.memory_space<vmem>>, vector<1x1x8x128xf32>
    %62 = vector.shape_cast %61 : vector<1x1x8x128xf32> to vector<8x128xf32>
    %63 = vector.shape_cast %50 : vector<8x128xf32> to vector<1x1x8x128xf32>
    tpu.vector_store %arg5[%c0_30, %c1_31, %c0_32, %c0_33], %63 {strides = array<i32>} : memref<1x3x8x128xf32, #tpu.memory_space<vmem>>, vector<1x1x8x128xf32>,
    %c0_34 = arith.constant 0 : index
    %c2_35 = arith.constant 2 : index
    %c0_36 = arith.constant 0 : index
    %c0_37 = arith.constant 0 : index
    %64 = vector.load %arg5[%c0_34, %c2_35, %c0_36, %c0_37] : memref<1x3x8x128xf32, #tpu.memory_space<vmem>>, vector<1x1x8x128xf32>
    %65 = vector.shape_cast %64 : vector<1x1x8x128xf32> to vector<8x128xf32>
    %66 = vector.shape_cast %57 : vector<8x128xf32> to vector<1x1x8x128xf32>
    tpu.vector_store %arg5[%c0_34, %c2_35, %c0_36, %c0_37], %66 {strides = array<i32>} : memref<1x3x8x128xf32, #tpu.memory_space<vmem>>, vector<1x1x8x128xf32>,
    return
  }
  func.func @transform_0(%arg0: i32, %arg1: i32) -> i32 {
    %c0_i32 = arith.constant 0 : i32
    %c0_i32_0 = arith.constant 0 : i32
    return %c0_i32 : i32
  }
  func.func @transform_1(%arg0: i32, %arg1: i32) -> i32 {
    %c0_i32 = arith.constant 0 : i32
    %c0_i32_0 = arith.constant 0 : i32
    return %c0_i32 : i32
  }
  func.func @transform_2(%arg0: i32, %arg1: i32) -> (i32, i32, i32, i32) {
    %c0_i32 = arith.constant 0 : i32
    %c0_i32_0 = arith.constant 0 : i32
    %c0_i32_1 = arith.constant 0 : i32
    return %arg0, %c0_i32, %arg1, %c0_i32_0 : i32, i32, i32, i32
  }
  func.func @transform_3(%arg0: i32, %arg1: i32) -> (i32, i32, i32, i32) {
    %c0_i32 = arith.constant 0 : i32
    %c0_i32_0 = arith.constant 0 : i32
    %c0_i32_1 = arith.constant 0 : i32
    return %arg0, %c0_i32, %arg1, %c0_i32_0 : i32, i32, i32, i32
  }
}

</mosaic_0001>

<bundles_post_ra>
// kernel: tpu_custom_call.1
= control target key start
LH: loop header
LB: loop body
LE: loop exit
PB: predicated region body
PF: predicated region fallthrough
CT: control target
= control target key end

     0   :  { %s863_s0 = inlined_call_operand.hbm [shape: f32[4], index: 0, kind: input, shape index: {}]   ;;  %s864_s1 = inlined_call_operand.vmem [shape: f32[2], index: 1, kind: input, shape index: {}]   ;;  %s865_s2 = inlined_call_operand.hbm [shape: f32[2,3,8,128], index: 2, kind: input, shape index: {}]   ;;  %s866_s3 = inlined_call_operand.hbm [shape: f32[2,3,8,128], index: 3, kind: output, shape index: {}]  }
   0x1   :  { %868 = sst [smem:[#allocation14_spill]] %s863_s0 }
   0x2   :  { %8 = vsyncpa [#allocation5], 0 }
   0x3   :  { %9 = vsyncpa [#allocation6], 0 }
   0x4   :  { %10 = vsyncpa [#allocation3], 0 }
   0x5   :  { %12 = vsyncpa [#allocation3 + $0x1], 0 }
   0x6   :  { %13 = vsyncpa [#allocation4], 0 }
   0x7   :  { %15 = vsyncpa [#allocation4 + $0x1], 0  ;;  %s679_s12 = smov 0   ;;  %s681_s13 = smov 0  }
   0x8   :  { %s683_s14 = smov 0   ;;  %s685_s15 = smov 0  }
   0x9   :  { %s687_s16 = smov 0   ;;  %s689_s17 = smov 0  }
   0xa LB: > { %s398_s18 = sadd.s32 4294967295, %s649_s17   ;;  %s399_s19 = sadd.s32 4294967294, %s649_s17   ;;  %s649_s17 = sphi %s689_s17, %s21_s17   ;;  %s645_s16 = sphi %s687_s16, %s884_s16   ;;  %s641_s15 = sphi %s685_s15, %s883_s15   ;;  %s637_s14 = sphi %s683_s14, %s882_s14   ;;  %s633_s13 = sphi %s681_s13, %s881_s13   ;;  %s629_s12 = sphi %s679_s12, %s880_s12  }
   0xb   : > { %s84_s20 = sadd.s32 1, %s637_s14  ;;  %p91_p0 = scmp.ne.s32.totalorder %s637_s14, %s633_s13 }
   0xc   : > { %p92_p1 = scmp.eq.s32.totalorder %s649_s17, 0  ;;  %p97_p2 = scmp.ne.s32.totalorder %s633_s13, %s629_s12 }
   0xd   : > { %p717_p3 = scmp.eq.s32.totalorder %s398_s18, 0  ;;  %p123_p4 = scmp.eq.s32.totalorder %s398_s18, 1 }
   0xe   : > { %p93_p5 = por %p92_p1, %p91_p0  ;;  %p129_p6 = scmp.eq.s32.totalorder %s399_s19, 1 }
   0xf   : > { %p723_p7 = por %p717_p3, %p97_p2  ;;  %p727_p8 = por %p123_p4, %p91_p0 }
  0x10   : > { %p731_p9 = por %p129_p6, %p97_p2  ;;  %p400_p10 = scmp.ge.s32.totalorder %s649_s17, 1 }
  0x11   : > { %s871_s23 = scalar_select %p727_p8, 1, 0 }
  0x12   : > { %s872_s24 = scalar_select %p731_p9, 1, 0 }
  0x13   : > { %p136_p11 = scmp.lt.s32.totalorder %s649_s17, 3  ;;  %p449_p1 = scmp.lt.s32.totalorder %s649_s17, 2 }
  0x14   : > { %s158_s28 = sshll.u32 %s864_s1, 4  ;;  %s169_s4 = sand.u32 1, %s637_s14   ;;  %s159_s28 = int_to_ptr.vmem [resolvable:$true] %s158_s28 }
  0x15   : > { %p738_p13 = pnand %p400_p10, %p136_p11  ;;  %p748_p4 = pnand %p449_p1, %p93_p5 }
  0x16   : > { %s33_s5 = sadd.s32 1, %s645_s16  ;;  %s651_s6 = smov [#allocation2]  }
  0x17   : > { %p432_p0 = pneg %p738_p13  ;;  %s876_s0 = sld [smem:[#allocation14_spill]] }
  0x18   : > { %s518_s9 = scalar_lea.vmem %s159_s28, 16  ;;  %p526_p1 = scmp.lt.s32.totalorder %s159_s28, %s159_s28 }
  0x19   : > { %p754_p2 = pnand %p432_p0, %p717_p3  ;;  %p519_p5 = scmp.ne.s32.totalorder %s159_s28, %s518_s9 }
  0x1a   : > { %p527_p0 = scmp.lt.s32.totalorder %s518_s9, %s518_s9 }
  0x1b   : > { %p520_p6 = pneg %p754_p2 }
  0x1c   : > { %p528_p12 = por %p527_p0, %p526_p1 }
  0x1d   : > { %435 = dma.hbm_to_smem (!%p754_p2), %s876_s0, 16, %s651_s6, [#allocation5]  }
  0x1e   : > { %p521_p10 = pnand %p520_p6, %p519_p5 }
  0x20   : > { %p522_p11 = pneg %p521_p10 }
  0x22   : > { %p529_p9 = pnand %p528_p12, %p522_p11 }
  0x24   : > { %532 = shalt.err (!%p529_p9)
}
  0x25   : > { %s652_s10 = smov [#allocation7]   ;;  %p35_p8 = scmp.ge.s32.totalorder %s33_s5, 2 }
  0x26   : > { %438 = dma.vmem_to_smem (!%p754_p2), %s159_s28, 16, %s652_s10, [#allocation6]  }
  0x27   : > { %s416_s11 = smul.u32 24, %s169_s4  ;;  %s886_s5 = smov (%p35_p8, %s33_s5), 0 }
  0x28   : > { %s417_s18 = smul.u32 384, %s645_s16  ;;  %s79_s19 = ssub.s32 %s645_s16, %s886_s5 }
  0x29   : > { %s173_s26 = scalar_lea.vmem [#allocation8], %s416_s11  ;;  %p82_p12 = scmp.eq.s32.totalorder %s79_s19, 0 }
  0x2a   : > { %s181_s27 = sshll.u32 %s173_s26, 4  ;;  %s180_s30 = scalar_lea.hbm %s865_s2, %s417_s18  ;;  %s182_s27 = int_to_ptr.vmem [resolvable:$true] %s181_s27 }
  0x2b   : > { %s780_s8 = scalar_select %p82_p12, %s637_s14, %s84_s20  }
  0x2c   : > { %s170_s9 = scalar_lea.sflag [#allocation3], %s169_s4  ;;  %p535_p9 = pneg %p748_p4 }
  0x2d   : > { %s546_s28 = scalar_lea.vmem %s182_s27, 384  ;;  %s653_s10 = smov [#allocation8]  }
  0x2e   : > { %p547_p8 = scmp.ne.s32.totalorder %s182_s27, %s546_s28  ;;  %s551_s0 = sshll.u32 %s653_s10, 4  ;;  %s552_s0 = int_to_ptr.vmem [resolvable:$false] %s551_s0 }
  0x2f   : > { %s553_s11 = scalar_lea.vmem %s552_s0, 768  ;;  %p554_p6 = scmp.lt.s32.totalorder %s182_s27, %s552_s0 }
  0x30   : > { %p549_p2 = pnand %p547_p8, %p535_p9  ;;  %p555_p10 = scmp.lt.s32.totalorder %s553_s11, %s546_s28 }
  0x32   : > { %p550_p5 = pneg %p549_p2  ;;  %p556_p11 = por %p555_p10, %p554_p6 }
  0x34   : > { %p557_p1 = pnand %p556_p11, %p550_p5 }
  0x36   : > { %560 = shalt.err (!%p557_p1)
}
  0x37   : > { %s654_s18 = smov 128   ;;  %s655_s20 = smov 8  }
  0x38   : > { %442 = dma.hbm_to_vmem [thread:$0]  (!%p748_p4), %s180_s30, 384, %s182_s27, %s170_s9, %s654_s18, %s654_s18, %s655_s20  }
  0x39   : > { %193 = sbr.rel (%p738_p13) target bundleno = 114 (0x72), region = 32 }
  0x3e   : > { %612 = dma.done.wait (%p717_p3), [#allocation5], 16  }
  0x3f   : > { %614 = vsyncadd (%p717_p3), [#allocation5], 4294967280 }
  0x40   : > { %616 = dma.done.wait (%p717_p3), [#allocation6], 16  }
  0x41   : > { %618 = vsyncadd (%p717_p3), [#allocation6], 4294967280  ;;  %s797_s0 = sand.u32 1, %s633_s13  }
  0x42   : > { %s418_s25 = smul.u32 24, %s797_s0  ;;  %s204_s29 = scalar_lea.sflag [#allocation3], %s797_s0 }
  0x44   : > { %s207_s4 = scalar_lea.vmem [#allocation8], %s418_s25 }
  0x45   : > { %620 = dma.done.wait (%p723_p7), %s204_s29, 384  }
  0x46   : > { %622 = vsyncadd (%p723_p7), %s204_s29, 4294966912 }
  0x47   : > { %212 = sfence }
  0x48   : > { %s236_s19 = sld [smem:[#allocation2]]  ;;  %v231_v0 = vld [vmem:[%s207_s4] sm:$0xff]  ;;  %v408_v1 = vld [vmem:[%s207_s4 + $0x8] sm:$0xff]  ;;  %v409_v2 = vld [vmem:[%s207_s4 + $0x10] sm:$0xff]  ;;  %s230_s22 = scalar_lea.vmem [#allocation9], %s418_s25 }
  0x49   : > { %s410_s21 = sld [smem:[#allocation2 + $0x2]]  ;;  %s289_s27 = sshll.u32 %s230_s22, 4  ;;  %s810_s27 = int_to_ptr.vmem [resolvable:$true] %s289_s27 }
  0x4a   : > { %s419_s6 = smul.u32 384, %s641_s15  ;;  %s275_s15 = scalar_lea.sflag [#allocation4], %s797_s0 }
  0x4b   : > { %s561_s28 = scalar_lea.vmem %s810_s27, 384  ;;  %p877_p7 = scmp.ne.s32.totalorder %s871_s23, 0 }
  0x4c   : > { %s815_s9 = scalar_lea.hbm %s866_s3, %s419_s6  ;;  %p562_p3 = scmp.ne.s32.totalorder %s810_s27, %s561_s28 }
  0x4d   : > { %s656_s10 = smov [#allocation9]  }
  0x4e   : > { %v237_v3 = vstv %s236_s19  ;;  %p563_p13 = pnand %p562_p3, %p877_p7  ;;  %s565_s11 = sshll.u32 %s656_s10, 4  ;;  %s566_s11 = int_to_ptr.vmem [resolvable:$false] %s565_s11 }
  0x4f   : > { %v238_v4 = vmul.f32 %v237_v3, %v231_v0  ;;  %v241_v5 = vmul.f32 %v408_v1, %v237_v3  ;;  %v244_v6 = vmul.f32 %v409_v2, %v237_v3  ;;  %s253_s26 = ssub.f32 1.0, %s410_s21  ;;  %v256_v16 = vstv %s410_s21  ;;  %s567_s18 = scalar_lea.vmem %s566_s11, 768 }
  0x50   : > { %p564_p4 = pneg %p563_p13  ;;  %p568_p0 = scmp.lt.s32.totalorder %s810_s27, %s566_s11 }
  0x51   : > { %v239_v7 = vmax.f32 %v238_v4, 0.0  ;;  %v242_v8 = vmax.f32 %v241_v5, 0.0  ;;  %v245_v9 = vmax.f32 %v244_v6, 0.0  ;;  %v254_v18 = vstv %s253_s26  ;;  %p569_p12 = scmp.lt.s32.totalorder %s567_s18, %s561_s28 }
  0x53   : > { %v240_v10 = vmin.f32 %v239_v7, 1.0  ;;  %v243_v11 = vmin.f32 %v242_v8, 1.0  ;;  %v246_v12 = vmin.f32 %v245_v9, 1.0  ;;  %p570_p9 = por %p569_p12, %p568_p0 }
  0x55   : > { %v248_v13 = vmul.f32 0.2989, %v240_v10  ;;  %v249_v14 = vmul.f32 0.587, %v243_v11  ;;  %v251_v15 = vmul.f32 0.114, %v246_v12  ;;  %v257_v20 = vmul.f32 %v256_v16, %v240_v10  ;;  %p571_p8 = pnand %p570_p9, %p564_p4 }
  0x56   : > { %v261_v21 = vmul.f32 %v256_v16, %v243_v11  ;;  %v265_v22 = vmul.f32 %v256_v16, %v246_v12 }
  0x57   : > { %v250_v17 = vadd.f32 %v249_v14, %v248_v13 }
  0x59   : > { %v252_v19 = vadd.f32 %v251_v15, %v250_v17 }
  0x5b   : > { %v255_v23 = vmul.f32 %v254_v18, %v252_v19 }
  0x5d   : > { %v258_v24 = vadd.f32 %v257_v20, %v255_v23  ;;  %v262_v25 = vadd.f32 %v261_v21, %v255_v23  ;;  %v266_v26 = vadd.f32 %v265_v22, %v255_v23 }
  0x5f   : > { %v259_v27 = vmax.f32 %v258_v24, 0.0  ;;  %v263_v28 = vmax.f32 %v262_v25, 0.0  ;;  %v267_v29 = vmax.f32 %v266_v26, 0.0 }
  0x61   : > { %v260_v30 = vmin.f32 %v259_v27, 1.0  ;;  %v264_v31 = vmin.f32 %v263_v28, 1.0  ;;  %v268_v32 = vmin.f32 %v267_v29, 1.0 }
  0x63   : > { %269 = vst [vmem:[%s230_s22] sm:$0xff] %v260_v30  ;;  %411 = vst [vmem:[%s230_s22 + $0x8] sm:$0xff] %v264_v31 }
  0x64   : > { %412 = vst [vmem:[%s230_s22 + $0x10] sm:$0xff] %v268_v32 }
  0x65   : > { %574 = shalt.err (!%p571_p8)
}
  0x66   : > { %s575_s20 = scalar_lea.hbm %s815_s9, 384  ;;  %s579_s4 = scalar_lea.hbm %s866_s3, 768 }
  0x67   : > { %p576_p2 = scmp.ne.s32.totalorder %s815_s9, %s575_s20  ;;  %p580_p10 = scmp.lt.s32.totalorder %s815_s9, %s866_s3 }
  0x68   : > { %p581_p11 = scmp.lt.s32.totalorder %s579_s4, %s575_s20 }
  0x69   : > { %p577_p5 = pnand %p576_p2, %p877_p7 }
  0x6a   : > { %p582_p1 = por %p581_p11, %p580_p10 }
  0x6b   : > { %p578_p6 = pneg %p577_p5 }
  0x6d   : > { %p583_p3 = pnand %p582_p1, %p578_p6 }
  0x6f   : > { %586 = shalt.err (!%p583_p3)
}
  0x70   : > { %s657_s26 = smov 128   ;;  %s658_s22 = smov 8  }
  0x71   : > { %430 = dma.vmem_to_hbm [thread:$0]  (%p877_p7), %s810_s27, 384, %s815_s9, %s275_s15, %s657_s26, %s657_s26, %s658_s22  }
  0x72 PF: > { %s304_s6 = sand.u32 1, %s629_s12   ;;  %p878_p13 = scmp.ne.s32.totalorder %s872_s24, 0 }
  0x73   : > { %p879_p4 = scmp.ge.s32.totalorder %s649_s17, 2  ;;  %s305_s7 = scalar_lea.sflag [#allocation4], %s304_s6 }
  0x75   : > { %p444_p0 = pnand %p879_p4, %p878_p13 }
  0x77   : > { %p445_p12 = pneg %p444_p0 }
  0x79   : > { %624 = dma.done.wait (%p445_p12), %s305_s7, 384  }
  0x7a   : > { %626 = vsyncadd (%p445_p12), %s305_s7, 4294966912  ;;  %s21_s17 = sadd.s32 1, %s649_s17   ;;  %s880_s12 = smov %s633_s13 }
  0x7b   : > { %p18_p9 = scmp.ge.s32.totalorder %s21_s17, 4   ;;  %s881_s13 = smov %s637_s14 }
  0x7c   : > { %s882_s14 = smov %s780_s8  ;;  %s883_s15 = smov %s645_s16 }
  0x7d   : > { %s884_s16 = smov %s886_s5  ;;  %20 = sbr.rel (!%p18_p9) target bundleno = 10 (0xa), region = 91 }
  0x82   :  { %310 = vsyncpa [#allocation3], 1 }
  0x83   :  { %312 = vsyncpa [#allocation3 + $0x1], 1 }
  0x84   :  { %313 = vsyncpa [#allocation4], 1 }
  0x85   :  { %315 = vsyncpa [#allocation4 + $0x1], 1 }
  0x86   :  { %316 = vsyncpa [#allocation5], 1 }
  0x87   :  { %318 = vsyncpa [#allocation5 + $0x1], 1 }
  0x88   :  { %319 = vsyncpa [#allocation6], 1 }
  0x89   :  { %321 = vsyncpa [#allocation6 + $0x1], 1 }

</bundles_post_ra>
